<compile_context>
chip_gen: v7x
topology: tpu7x:2x2x1
jax: 0.10.0
libtpu: 0.0.40
codegen_flags: <defaults>
</compile_context>

<pallas_src>
import functools

import jax
import jax.numpy as jnp
import numpy as np
from jax.experimental import pallas as pl
from jax.experimental.pallas import tpu as pltpu

# ---- module hyper-parameters (small demo sizes consistent with the module) --
BATCH = 2
IN_CH = 16        # in_channels
T = 32            # time steps      -> lane-dense C*T = 512 = 4x128
SE_BN = 128       # bottleneck_channels (ECAPA uses 128; = one full lane vreg)
EPS = 1e-5


# --------------------------- Pallas kernel ----------------------------------
def _se_kernel(x_ref, w1_ref, b1_ref, w2_ref, b2_ref, o_ref):
    x = x_ref[...]                                             # (B, C*T)

    # pool + conv1 (1x1, no bias) + folded BatchNorm, then ReLU -> (B, SE_BN)
    h = jnp.dot(x, w1_ref[...],
                preferred_element_type=jnp.float32) + b1_ref[...]
    h = jnp.maximum(h, 0.0)

    # conv2 (1x1, with bias) + broadcast over time, then sigmoid -> (B, C*T)
    g = jnp.dot(h, w2_ref[...],
                preferred_element_type=jnp.float32) + b2_ref[...]

    o_ref[...] = x * jax.nn.sigmoid(g)


@jax.jit
def squeeze_excitation(x, w1f, b1, w2f, b2f):
    B, C, Tt = x.shape
    x_flat = x.reshape(B, C * Tt)                              # lane-dense (B, C*T)
    vmem = pltpu.MemorySpace.VMEM
    out_flat = pl.pallas_call(
        _se_kernel,
        out_shape=jax.ShapeDtypeStruct((B, C * Tt), jnp.float32),
        in_specs=[pl.BlockSpec(memory_space=vmem)] * 5,
        out_specs=pl.BlockSpec(memory_space=vmem),
    )(x_flat, w1f, b1, w2f, b2f)
    return out_flat.reshape(B, C, Tt)


# --------------------------- parameters -------------------------------------
def init_params(key):
    ks = jax.random.split(key, 7)
    w1 = (0.2 * jax.random.normal(ks[0], (SE_BN, IN_CH))).astype(jnp.float32)
    gamma = 1.0 + 0.1 * jax.random.normal(ks[1], (SE_BN,))
    beta = 0.1 * jax.random.normal(ks[2], (SE_BN,))
    mean = 0.1 * jax.random.normal(ks[3], (SE_BN,))
    var = jax.random.uniform(ks[4], (SE_BN,), minval=0.5, maxval=1.5)
    bn_scale = (gamma / jnp.sqrt(var + EPS)).astype(jnp.float32)
    bn_shift = (beta - mean * bn_scale).astype(jnp.float32)
    w2 = (0.2 * jax.random.normal(ks[5], (IN_CH, SE_BN))).astype(jnp.float32)
    b2 = (0.1 * jax.random.normal(ks[6], (IN_CH,))).astype(jnp.float32)
    return dict(w1=w1, bn_scale=bn_scale, bn_shift=bn_shift, w2=w2, b2=b2)


def pack_kernel_args(P):
    """Fold mean-pool (1/T), BatchNorm, and the time broadcast into the weights."""
    # 0/1 indicator: pool[c*T + t, c] = 1 (matches x.reshape(B, C*T) layout)
    pool = np.zeros((IN_CH * T, IN_CH), np.float32)
    for c in range(IN_CH):
        pool[c * T:(c + 1) * T, c] = 1.0

    w1 = np.asarray(P['w1'])
    bn_scale = np.asarray(P['bn_scale'])
    bn_shift = np.asarray(P['bn_shift'])
    w2 = np.asarray(P['w2'])
    b2 = np.asarray(P['b2'])

    w1t = (w1 * bn_scale[:, None]).T / float(T)                # (C, SE_BN)
    w1f = pool @ w1t                                           # (C*T, SE_BN)
    b1 = bn_shift.reshape(1, SE_BN)                            # (1, SE_BN)
    w2f = w2.T @ pool.T                                        # (SE_BN, C*T)
    b2f = np.repeat(b2, T).reshape(1, IN_CH * T)               # (1, C*T)

    return (jnp.asarray(w1f, dtype=jnp.float32),
            jnp.asarray(b1, dtype=jnp.float32),
            jnp.asarray(w2f, dtype=jnp.float32),
            jnp.asarray(b2f, dtype=jnp.float32))


# --------------------------- pure-JAX reference ------------------------------
def reference(x, P):
    pooled = jnp.mean(x, axis=2, keepdims=True)                  # (B, C, 1)
    h = jnp.einsum('oc,bci->boi', P['w1'], pooled)               # (B, SE_BN, 1)
    h = jax.nn.relu(h * P['bn_scale'][None, :, None]
                    + P['bn_shift'][None, :, None])
    g = jnp.einsum('oc,bci->boi', P['w2'], h) + P['b2'][None, :, None]
    g = jax.nn.sigmoid(g)                                        # (B, C, 1)
    return x * g


# ------------------------------- main ----------------------------------------
if __name__ == "__main__":
    key = jax.random.PRNGKey(0)
    kp, kx = jax.random.split(key)
    P = init_params(kp)
    x = jax.random.normal(kx, (BATCH, IN_CH, T), dtype=jnp.float32)

    w1f, b1, w2f, b2f = pack_kernel_args(P)
    out = jax.block_until_ready(squeeze_excitation(x, w1f, b1, w2f, b2f))

    ref = reference(x, P)
    np.testing.assert_allclose(np.asarray(out), np.asarray(ref),
                               rtol=1e-4, atol=1e-4)
    print("KERNEL_OK")
</pallas_src>

<mosaic_0001>
module attributes {stable_mosaic.version = 11 : i64} {
  func.func @_se_kernel(%arg0: memref<2x512xf32, #tpu.memory_space<vmem>>, %arg1: memref<512x128xf32, #tpu.memory_space<vmem>>, %arg2: memref<1x128xf32, #tpu.memory_space<vmem>>, %arg3: memref<128x512xf32, #tpu.memory_space<vmem>>, %arg4: memref<1x512xf32, #tpu.memory_space<vmem>>, %arg5: memref<2x512xf32, #tpu.memory_space<vmem>>) attributes {dimension_semantics = [], scalar_prefetch = 0 : i64, scratch_operands = 0 : i64, tpu.core_type = #tpu.core_type<tc>} {
    %c0 = arith.constant 0 : index
    %c0_0 = arith.constant 0 : index
    %0 = vector.load %arg0[%c0, %c0_0] : memref<2x512xf32, #tpu.memory_space<vmem>>, vector<2x512xf32>
    %c0_1 = arith.constant 0 : index
    %c0_2 = arith.constant 0 : index
    %1 = vector.load %arg1[%c0_1, %c0_2] : memref<512x128xf32, #tpu.memory_space<vmem>>, vector<512x128xf32>
    %cst = arith.constant dense<0.000000e+00> : vector<2x128xf32>
    %2 = tpu.matmul %0, %1, %cst {dimension_numbers = #tpu.dot_dimension_numbers<[1], [0], [0], [1], [0, 0, 1, 1], [], []>} : vector<2x512xf32>, vector<512x128xf32>, vector<2x128xf32> -> vector<2x128xf32>
    %c0_3 = arith.constant 0 : index
    %c0_4 = arith.constant 0 : index
    %3 = vector.load %arg2[%c0_3, %c0_4] : memref<1x128xf32, #tpu.memory_space<vmem>>, vector<1x128xf32>
    %4 = vector.broadcast %3 : vector<1x128xf32> to vector<2x128xf32>
    %5 = arith.addf %2, %4 : vector<2x128xf32>
    %cst_5 = arith.constant 0.000000e+00 : f32
    %6 = vector.broadcast %cst_5 : f32 to vector<2x128xf32>
    %7 = arith.maximumf %5, %6 : vector<2x128xf32>
    %c0_6 = arith.constant 0 : index
    %c0_7 = arith.constant 0 : index
    %8 = vector.load %arg3[%c0_6, %c0_7] : memref<128x512xf32, #tpu.memory_space<vmem>>, vector<128x512xf32>
    %cst_8 = arith.constant dense<0.000000e+00> : vector<2x512xf32>
    %9 = tpu.matmul %7, %8, %cst_8 {dimension_numbers = #tpu.dot_dimension_numbers<[1], [0], [0], [1], [0, 0, 1, 1], [], []>} : vector<2x128xf32>, vector<128x512xf32>, vector<2x512xf32> -> vector<2x512xf32>
    %c0_9 = arith.constant 0 : index
    %c0_10 = arith.constant 0 : index
    %10 = vector.load %arg4[%c0_9, %c0_10] : memref<1x512xf32, #tpu.memory_space<vmem>>, vector<1x512xf32>
    %11 = vector.broadcast %10 : vector<1x512xf32> to vector<2x512xf32>
    %12 = arith.addf %9, %11 : vector<2x512xf32>
    %13 = arith.negf %12 : vector<2x512xf32>
    %14 = math.exp %13 : vector<2x512xf32>
    %cst_11 = arith.constant 1.000000e+00 : f32
    %15 = vector.broadcast %cst_11 : f32 to vector<2x512xf32>
    %16 = arith.addf %15, %14 : vector<2x512xf32>
    %17 = arith.divf %15, %16 : vector<2x512xf32>
    %18 = arith.mulf %0, %17 : vector<2x512xf32>
    %c0_12 = arith.constant 0 : index
    %c0_13 = arith.constant 0 : index
    %19 = vector.load %arg5[%c0_12, %c0_13] : memref<2x512xf32, #tpu.memory_space<vmem>>, vector<2x512xf32>
    tpu.vector_store %arg5[%c0_12, %c0_13], %18 {strides = array<i32>} : memref<2x512xf32, #tpu.memory_space<vmem>>, vector<2x512xf32>,
    return
  }
}

</mosaic_0001>

<bundles_post_ra>
// kernel: squeeze_excitation.1
= control target key start
LH: loop header
LB: loop body
LE: loop exit
PB: predicated region body
PF: predicated region fallthrough
CT: control target
= control target key end

     0   :  { %10 = vsyncpa [#allocation3], 0  ;;  %s934_s0 = inlined_call_operand.vmem [shape: f32[2,512], index: 0, kind: input, shape index: {}]   ;;  %s935_s1 = inlined_call_operand.hbm [shape: f32[512,128], index: 1, kind: input, shape index: {}]   ;;  %s936_s2 = inlined_call_operand.vmem [shape: f32[1,128], index: 2, kind: input, shape index: {}]   ;;  %s937_s3 = inlined_call_operand.hbm [shape: f32[128,512], index: 3, kind: input, shape index: {}]   ;;  %s938_s4 = inlined_call_operand.vmem [shape: f32[1,512], index: 4, kind: input, shape index: {}]   ;;  %s939_s5 = inlined_call_operand.vmem [shape: f32[2,512], index: 5, kind: output, shape index: {}]  }
   0x1   :  { %11 = vsyncpa [#allocation5], 0  ;;  %s841_s18 = smov [#allocation2]   ;;  %s793_s22 = scalar_lea.hbm %s935_s1, 8192 }
   0x2   :  { %s19_s19 = sshll.u32 %s841_s18, 4  ;;  %p794_p0 = scmp.ne.s32.totalorder %s935_s1, %s793_s22  ;;  %s20_s19 = int_to_ptr.vmem [resolvable:$true] %s19_s19 }
   0x3   :  { %p797_p1 = scmp.lt.u32.totalorder %s793_s22, %s935_s1 }
   0x5   :  { %p799_p2 = pnand %p797_p1, %p794_p0 }
   0x7   :  { %802 = shalt.err (!%p799_p2)
}
   0x8   :  { %s803_s27 = scalar_lea.vmem %s20_s19, 8192  ;;  %p808_p4 = scmp.lt.s32.totalorder %s20_s19, %s20_s19 }
   0x9   :  { %p804_p3 = scmp.ne.s32.totalorder %s20_s19, %s803_s27  ;;  %p809_p5 = scmp.lt.s32.totalorder %s803_s27, %s803_s27 }
   0xb   :  { %p810_p6 = por %p809_p5, %p808_p4 }
   0xd   :  { %p811_p7 = pnand %p810_p6, %p804_p3 }
   0xf   :  { %814 = shalt.err (!%p811_p7)
}
  0x10   :  { %s842_s28 = smov 128   ;;  %s843_s29 = smov 8  }
  0x11   :  { %25 = dma.hbm_to_vmem [thread:$0]  %s935_s1, 8192, %s20_s19, [#allocation3], %s842_s28, %s842_s28, %s843_s29  }
  0x12   :  { %s844_s7 = smov [#allocation4]   ;;  %s815_s11 = scalar_lea.hbm %s937_s3, 8192 }
  0x13   :  { %s33_s8 = sshll.u32 %s844_s7, 4  ;;  %p816_p8 = scmp.ne.s32.totalorder %s937_s3, %s815_s11  ;;  %s34_s8 = int_to_ptr.vmem [resolvable:$true] %s33_s8 }
  0x14   :  { %p819_p9 = scmp.lt.u32.totalorder %s815_s11, %s937_s3 }
  0x16   :  { %p821_p10 = pnand %p819_p9, %p816_p8 }
  0x18   :  { %824 = shalt.err (!%p821_p10)
}
  0x19   :  { %s825_s16 = scalar_lea.vmem %s34_s8, 8192  ;;  %p830_p12 = scmp.lt.s32.totalorder %s34_s8, %s34_s8 }
  0x1a   :  { %p826_p11 = scmp.ne.s32.totalorder %s34_s8, %s825_s16  ;;  %p831_p13 = scmp.lt.s32.totalorder %s825_s16, %s825_s16 }
  0x1c   :  { %p832_p0 = por %p831_p13, %p830_p12 }
  0x1e   :  { %p833_p1 = pnand %p832_p0, %p826_p11 }
  0x20   :  { %836 = shalt.err (!%p833_p1)
}
  0x21   :  { %s845_s1 = smov 512   ;;  %s846_s17 = smov 32  }
  0x22   :  { %39 = dma.hbm_to_vmem [thread:$0]  %s937_s3, 8192, %s34_s8, [#allocation5], %s845_s1, %s845_s1, %s846_s17  }
  0x23   :  { %837 = dma.done.wait [#allocation3], 8192  }
  0x24   :  { %838 = vsyncadd [#allocation3], 4294959104 }
  0x25   :  { %839 = dma.done.wait [#allocation5], 8192  }
  0x26   :  { %840 = vsyncadd [#allocation5], 4294959104  ;;  %v65_v0 = vld [vmem:[#allocation2 + $0x80] sm:$0xff]  ;;  %v66_v1 = vld [vmem:[#allocation2 + $0x88] sm:$0xff]  ;;  %v847_v47 = vmov 1983009808   ;;  %v125_v49 = vlaneseq }
  0x27   :  { %v49_v2 = vld [vmem:[#allocation2] sm:$0xff]  ;;  %v640_v3 = vpack.c.bf16 %v66_v1, %v65_v0  ;;  %v50_v4 = vld [vmem:[#allocation2 + $0x8] sm:$0xff]  ;;  %v67_v11 = vld [vmem:[#allocation2 + $0x90] sm:$0xff]  ;;  %v123_v48 = vunpack.c.l.s4 %v847_v47 }
  0x28   :  { %v97_v5 = vld [vmem:[#allocation2 + $0x180] sm:$0xff]  ;;  %v98_v6 = vld [vmem:[#allocation2 + $0x188] sm:$0xff]  ;;  %v642_v7 = vpack.c.bf16 %v50_v4, %v49_v2  ;;  %v68_v13 = vld [vmem:[#allocation2 + $0x98] sm:$0xff]  ;;  %v903_v0 = vshrl.u32 %v125_v49, 7 }
  0x29   :  { %v672_v8 = vpack.c.bf16 %v98_v6, %v97_v5  ;;  %v81_v9 = vld [vmem:[#allocation2 + $0x100] sm:$0xff]  ;;  %v82_v10 = vld [vmem:[#allocation2 + $0x108] sm:$0xff]  ;;  %641 = vmatprep.subr.bf16.mxu0 %v640_v3  ;;  %v51_v14 = vld [vmem:[#allocation2 + $0x10] sm:$0xff]  ;;  %v644_v16 = vpack.c.bf16 %v68_v13, %v67_v11  ;;  %v124_v63 = vunpack.c.0.s8 %v123_v48 }
  0x2a   :  { %v674_v12 = vpack.c.bf16 %v82_v10, %v81_v9  ;;  %v52_v15 = vld [vmem:[#allocation2 + $0x18] sm:$0xff]  ;;  %643 = vmatpush3.bf16.msra.mxu0 %v642_v7  ;;  %v99_v18 = vld [vmem:[#allocation2 + $0x190] sm:$0xff]  ;;  %v69_v23 = vld [vmem:[#allocation2 + $0xa0] sm:$0xff] }
  0x2b   :  { %673 = vmatprep.subr.bf16.mxu1 %v672_v8  ;;  %v646_v17 = vpack.c.bf16 %v52_v15, %v51_v14  ;;  %v100_v19 = vld [vmem:[#allocation2 + $0x198] sm:$0xff]  ;;  %v83_v20 = vld [vmem:[#allocation2 + $0x110] sm:$0xff]  ;;  %v70_v24 = vld [vmem:[#allocation2 + $0xa8] sm:$0xff]  ;;  %645 = vmatprep.subr.bf16.mxu0 %v644_v16  ;;  %v906_v13 = vsub.s32 %v124_v63, %v903_v0 }
  0x2c   :  { %675 = vmatpush3.bf16.msra.mxu1 %v674_v12  ;;  %v676_v21 = vpack.c.bf16 %v100_v19, %v99_v18  ;;  %v84_v22 = vld [vmem:[#allocation2 + $0x118] sm:$0xff]  ;;  %v648_v26 = vpack.c.bf16 %v70_v24, %v69_v23  ;;  %v53_v27 = vld [vmem:[#allocation2 + $0x20] sm:$0xff]  ;;  %v54_v28 = vld [vmem:[#allocation2 + $0x28] sm:$0xff] }
  0x2d   :  { %v678_v25 = vpack.c.bf16 %v84_v22, %v83_v20  ;;  %v101_v29 = vld [vmem:[#allocation2 + $0x1a0] sm:$0xff]  ;;  %v102_v30 = vld [vmem:[#allocation2 + $0x1a8] sm:$0xff]  ;;  %v650_v33 = vpack.c.bf16 %v54_v28, %v53_v27  ;;  %v71_v35 = vld [vmem:[#allocation2 + $0xb0] sm:$0xff] }
  0x2e   :  { %677 = vmatprep.subr.bf16.mxu1 %v676_v21  ;;  %v85_v31 = vld [vmem:[#allocation2 + $0x120] sm:$0xff]  ;;  %v86_v32 = vld [vmem:[#allocation2 + $0x128] sm:$0xff]  ;;  %647 = vmatpush3.bf16.msra.mxu0 %v646_v17  ;;  %v680_v34 = vpack.c.bf16 %v102_v30, %v101_v29  ;;  %v72_v36 = vld [vmem:[#allocation2 + $0xb8] sm:$0xff] }
  0x2f   :  { %v55_v37 = vld [vmem:[#allocation2 + $0x30] sm:$0xff]  ;;  %649 = vmatprep.subr.bf16.mxu0 %v648_v26  ;;  %v682_v38 = vpack.c.bf16 %v86_v32, %v85_v31  ;;  %v652_v39 = vpack.c.bf16 %v72_v36, %v71_v35  ;;  %v56_v40 = vld [vmem:[#allocation2 + $0x38] sm:$0xff]  ;;  %v73_v46 = vld [vmem:[#allocation2 + $0xc0] sm:$0xff] }
  0x30   :  { %679 = vmatpush3.bf16.msra.mxu1 %v678_v25  ;;  %v103_v41 = vld [vmem:[#allocation2 + $0x1b0] sm:$0xff]  ;;  %v104_v42 = vld [vmem:[#allocation2 + $0x1b8] sm:$0xff]  ;;  %v74_v50 = vld [vmem:[#allocation2 + $0xc8] sm:$0xff]  ;;  %v654_v51 = vpack.c.bf16 %v56_v40, %v55_v37 }
  0x31   :  { %681 = vmatprep.subr.bf16.mxu1 %v680_v34  ;;  %v684_v43 = vpack.c.bf16 %v104_v42, %v103_v41  ;;  %v87_v44 = vld [vmem:[#allocation2 + $0x130] sm:$0xff]  ;;  %v88_v45 = vld [vmem:[#allocation2 + $0x138] sm:$0xff]  ;;  %v105_v52 = vld [vmem:[#allocation2 + $0x1c0] sm:$0xff]  ;;  %v656_v55 = vpack.c.bf16 %v74_v50, %v73_v46 }
  0x32   :  { %651 = vmatpush3.bf16.msra.mxu0 %v650_v33  ;;  %v106_v53 = vld [vmem:[#allocation2 + $0x1c8] sm:$0xff]  ;;  %v686_v54 = vpack.c.bf16 %v88_v45, %v87_v44  ;;  %v57_v56 = vld [vmem:[#allocation2 + $0x40] sm:$0xff]  ;;  %v75_v61 = vld [vmem:[#allocation2 + $0xd0] sm:$0xff] }
  0x33   :  { %653 = vmatprep.subr.bf16.mxu0 %v652_v39  ;;  %v58_v57 = vld [vmem:[#allocation2 + $0x48] sm:$0xff]  ;;  %v89_v58 = vld [vmem:[#allocation2 + $0x140] sm:$0xff]  ;;  %v688_v59 = vpack.c.bf16 %v106_v53, %v105_v52  ;;  %v76_v62 = vld [vmem:[#allocation2 + $0xd8] sm:$0xff] }
  0x34   :  { %683 = vmatpush3.bf16.msra.mxu1 %v682_v38  ;;  %v90_v60 = vld [vmem:[#allocation2 + $0x148] sm:$0xff]  ;;  %v107_v1 = vld [vmem:[#allocation2 + $0x1d0] sm:$0xff]  ;;  %v108_v2 = vld [vmem:[#allocation2 + $0x1d8] sm:$0xff]  ;;  %v658_v3 = vpack.c.bf16 %v58_v57, %v57_v56  ;;  %v660_v5 = vpack.c.bf16 %v76_v62, %v75_v61 }
  0x35   :  { %685 = vmatprep.subr.bf16.mxu1 %v684_v43  ;;  %v690_v4 = vpack.c.bf16 %v90_v60, %v89_v58  ;;  %v59_v6 = vld [vmem:[#allocation2 + $0x50] sm:$0xff]  ;;  %v60_v7 = vld [vmem:[#allocation2 + $0x58] sm:$0xff]  ;;  %v692_v9 = vpack.c.bf16 %v108_v2, %v107_v1  ;;  %v77_v11 = vld [vmem:[#allocation2 + $0xe0] sm:$0xff] }
  0x36   :  { %655 = vmatpush3.bf16.msra.mxu0 %v654_v51  ;;  %v91_v8 = vld [vmem:[#allocation2 + $0x150] sm:$0xff]  ;;  %v92_v10 = vld [vmem:[#allocation2 + $0x158] sm:$0xff]  ;;  %v78_v12 = vld [vmem:[#allocation2 + $0xe8] sm:$0xff]  ;;  %v662_v16 = vpack.c.bf16 %v60_v7, %v59_v6 }
  0x37   :  { %657 = vmatprep.subr.bf16.mxu0 %v656_v55  ;;  %v109_v14 = vld [vmem:[#allocation2 + $0x1e0] sm:$0xff]  ;;  %v110_v15 = vld [vmem:[#allocation2 + $0x1e8] sm:$0xff]  ;;  %v694_v18 = vpack.c.bf16 %v92_v10, %v91_v8  ;;  %v664_v19 = vpack.c.bf16 %v78_v12, %v77_v11  ;;  %v79_v25 = vld [vmem:[#allocation2 + $0xf0] sm:$0xff] }
  0x38   :  { %687 = vmatpush3.bf16.msra.mxu1 %v686_v54  ;;  %v61_v17 = vld [vmem:[#allocation2 + $0x60] sm:$0xff]  ;;  %v62_v20 = vld [vmem:[#allocation2 + $0x68] sm:$0xff]  ;;  %v696_v23 = vpack.c.bf16 %v110_v15, %v109_v14  ;;  %v80_v26 = vld [vmem:[#allocation2 + $0xf8] sm:$0xff] }
  0x39   :  { %689 = vmatprep.subr.bf16.mxu1 %v688_v59  ;;  %v93_v21 = vld [vmem:[#allocation2 + $0x160] sm:$0xff]  ;;  %v94_v24 = vld [vmem:[#allocation2 + $0x168] sm:$0xff]  ;;  %v111_v29 = vld [vmem:[#allocation2 + $0x1f0] sm:$0xff]  ;;  %v666_v31 = vpack.c.bf16 %v62_v20, %v61_v17  ;;  %v668_v35 = vpack.c.bf16 %v80_v26, %v79_v25 }
  0x3a   :  { %659 = vmatpush3.bf16.msra.mxu0 %v658_v3  ;;  %v911_v22 = vld [vmem:[%s934_s0] sm:$0xff]  ;;  %v112_v30 = vld [vmem:[#allocation2 + $0x1f8] sm:$0xff]  ;;  %v698_v34 = vpack.c.bf16 %v94_v24, %v93_v21  ;;  %v63_v36 = vld [vmem:[#allocation2 + $0x70] sm:$0xff] }
  0x3b   :  { %661 = vmatprep.subr.bf16.mxu0 %v660_v5  ;;  %v128_v27 = vrot.slane %v911_v22, %v906_v13  ;;  %v121_v28 = vcombine.high %v911_v22, %v911_v22  ;;  %v64_v37 = vld [vmem:[#allocation2 + $0x78] sm:$0xff]  ;;  %v95_v38 = vld [vmem:[#allocation2 + $0x170] sm:$0xff]  ;;  %v700_v39 = vpack.c.bf16 %v112_v30, %v111_v29  ;;  %v284_v42 = vld [vmem:[#allocation4 + $0x8] sm:$0xff] }
  0x3c   :  { %691 = vmatpush3.bf16.msra.mxu1 %v690_v4  ;;  %v96_v40 = vld [vmem:[#allocation2 + $0x178] sm:$0xff]  ;;  %v288_v43 = vld [vmem:[#allocation4 + $0x28] sm:$0xff]  ;;  %v670_v46 = vpack.c.bf16 %v64_v37, %v63_v36  ;;  %v283_v49 = vld [vmem:[#allocation4] sm:$0xff] }
  0x3d   :  { %693 = vmatprep.subr.bf16.mxu1 %v692_v9  ;;  %v136_v32 = vcombine.high %v128_v27, %v128_v27  ;;  %v135_v33 = vrot.slane %v121_v28, %v906_v13  ;;  %v286_v44 = vld [vmem:[#allocation4 + $0x18] sm:$0xff]  ;;  %v702_v47 = vpack.c.bf16 %v96_v40, %v95_v38  ;;  %v704_v48 = vpack.c.bf16 %v288_v43, %v284_v42  ;;  %v287_v50 = vld [vmem:[#allocation4 + $0x20] sm:$0xff]  ;;  %v285_v51 = vld [vmem:[#allocation4 + $0x10] sm:$0xff] }
  0x3e   :  { %663 = vmatpush3.bf16.msra.mxu0 %v662_v16  ;;  %v290_v45 = vld [vmem:[#allocation4 + $0x38] sm:$0xff]  ;;  %v289_v53 = vld [vmem:[#allocation4 + $0x30] sm:$0xff]  ;;  %v292_v54 = vld [vmem:[#allocation4 + $0x48] sm:$0xff]  ;;  %v706_v58 = vpack.c.bf16 %v287_v50, %v283_v49 }
  0x3f   :  { %665 = vmatprep.subr.bf16.mxu0 %v664_v19  ;;  %206 = vmatprep.mubr.f32.mxu0 %v136_v32  ;;  %v137_v41 = vcombine.high %v135_v33, %v135_v33  ;;  %v736_v52 = vpack.c.bf16 %v290_v45, %v286_v44  ;;  %v296_v55 = vld [vmem:[#allocation4 + $0x68] sm:$0xff]  ;;  %v294_v56 = vld [vmem:[#allocation4 + $0x58] sm:$0xff]  ;;  %v738_v59 = vpack.c.bf16 %v289_v53, %v285_v51  ;;  %v291_v61 = vld [vmem:[#allocation4 + $0x40] sm:$0xff] }
  0x40   :  { %695 = vmatpush3.bf16.msra.mxu1 %v694_v18  ;;  %v298_v57 = vld [vmem:[#allocation4 + $0x78] sm:$0xff]  ;;  %v708_v60 = vpack.c.bf16 %v296_v55, %v292_v54  ;;  %v295_v62 = vld [vmem:[#allocation4 + $0x60] sm:$0xff]  ;;  %v293_v63 = vld [vmem:[#allocation4 + $0x50] sm:$0xff] }
  0x41   :  { %697 = vmatprep.subr.bf16.mxu1 %v696_v23  ;;  %276 = vmatprep.mubr.f32.mxu1 %v137_v41  ;;  %v740_v1 = vpack.c.bf16 %v298_v57, %v294_v56  ;;  %v297_v2 = vld [vmem:[#allocation4 + $0x70] sm:$0xff]  ;;  %v300_v3 = vld [vmem:[#allocation4 + $0x88] sm:$0xff]  ;;  %v302_v5 = vld [vmem:[#allocation4 + $0x98] sm:$0xff]  ;;  %v710_v7 = vpack.c.bf16 %v295_v62, %v291_v61 }
  0x42   :  { %667 = vmatpush3.bf16.msra.mxu0 %v666_v31  ;;  %v304_v4 = vld [vmem:[#allocation4 + $0xa8] sm:$0xff]  ;;  %v306_v6 = vld [vmem:[#allocation4 + $0xb8] sm:$0xff]  ;;  %v742_v8 = vpack.c.bf16 %v297_v2, %v293_v63  ;;  %v299_v10 = vld [vmem:[#allocation4 + $0x80] sm:$0xff] }
  0x43   :  { %669 = vmatprep.subr.bf16.mxu0 %v668_v35  ;;  %v712_v9 = vpack.c.bf16 %v304_v4, %v300_v3  ;;  %v303_v11 = vld [vmem:[#allocation4 + $0xa0] sm:$0xff]  ;;  %v301_v12 = vld [vmem:[#allocation4 + $0x90] sm:$0xff]  ;;  %v744_v14 = vpack.c.bf16 %v306_v6, %v302_v5  ;;  %v308_v16 = vld [vmem:[#allocation4 + $0xc8] sm:$0xff] }
  0x44   :  { %699 = vmatpush3.bf16.msra.mxu1 %v698_v34  ;;  %v305_v15 = vld [vmem:[#allocation4 + $0xb0] sm:$0xff]  ;;  %v312_v17 = vld [vmem:[#allocation4 + $0xe8] sm:$0xff]  ;;  %v310_v18 = vld [vmem:[#allocation4 + $0xd8] sm:$0xff]  ;;  %v714_v20 = vpack.c.bf16 %v303_v11, %v299_v10 }
  0x45   :  { %701 = vmatprep.subr.bf16.mxu1 %v700_v39  ;;  %v314_v19 = vld [vmem:[#allocation4 + $0xf8] sm:$0xff]  ;;  %v746_v21 = vpack.c.bf16 %v305_v15, %v301_v12  ;;  %v716_v23 = vpack.c.bf16 %v312_v17, %v308_v16  ;;  %v307_v24 = vld [vmem:[#allocation4 + $0xc0] sm:$0xff]  ;;  %v309_v26 = vld [vmem:[#allocation4 + $0xd0] sm:$0xff]  ;;  %v848_v17 = vmov 0.0  }
  0x46   :  { %671 = vmatpush3.bf16.msra.mxu0 %v670_v46  ;;  %v311_v25 = vld [vmem:[#allocation4 + $0xe0] sm:$0xff]  ;;  %v313_v28 = vld [vmem:[#allocation4 + $0xf0] sm:$0xff]  ;;  %v316_v29 = vld [vmem:[#allocation4 + $0x108] sm:$0xff] }
  0x47   :  { %705 = vmatprep.subr.bf16.mxu0 %v704_v48  ;;  %v320_v30 = vld [vmem:[#allocation4 + $0x128] sm:$0xff]  ;;  %v318_v31 = vld [vmem:[#allocation4 + $0x118] sm:$0xff]  ;;  %v750_v34 = vpack.c.bf16 %v313_v28, %v309_v26  ;;  %v315_v36 = vld [vmem:[#allocation4 + $0x100] sm:$0xff] }
  0x48   :  { %703 = vmatpush3.bf16.msra.mxu1 %v702_v47  ;;  %v322_v32 = vld [vmem:[#allocation4 + $0x138] sm:$0xff]  ;;  %v720_v35 = vpack.c.bf16 %v320_v30, %v316_v29  ;;  %v319_v37 = vld [vmem:[#allocation4 + $0x120] sm:$0xff]  ;;  %v317_v38 = vld [vmem:[#allocation4 + $0x110] sm:$0xff]  ;;  %v351_v29 = vsub.s32 0, %v903_v0  ;;  %v359_v30 = vsub.s32 2, %v903_v0 }
  0x49   :  { %737 = vmatprep.subr.bf16.mxu1 %v736_v52  ;;  %207 = vmatmul.mubr.f32.vlgmr.msra.gmra.mrb[0].mxu0 %v128_v27  ;;  %v748_v27 = vpack.c.bf16 %v314_v19, %v310_v18  ;;  %v752_v39 = vpack.c.bf16 %v322_v32, %v318_v31  ;;  %v321_v40 = vld [vmem:[#allocation4 + $0x130] sm:$0xff]  ;;  %v324_v41 = vld [vmem:[#allocation4 + $0x148] sm:$0xff]  ;;  %v326_v43 = vld [vmem:[#allocation4 + $0x158] sm:$0xff]  ;;  %v722_v45 = vpack.c.bf16 %v319_v37, %v315_v36  ;;  %v355_v32 = vsub.s32 1, %v903_v0 }
  0x4a   :  { %707 = vmatpush1.bf16.msra.mxu0 %v706_v58  ;;  %v328_v42 = vld [vmem:[#allocation4 + $0x168] sm:$0xff]  ;;  %v330_v44 = vld [vmem:[#allocation4 + $0x178] sm:$0xff]  ;;  %v754_v46 = vpack.c.bf16 %v321_v40, %v317_v38  ;;  %v323_v48 = vld [vmem:[#allocation4 + $0x140] sm:$0xff]  ;;  %433 = vmatprep.mubr.f32.mxu0 %v848_v17 }
  0x4b   :  { %277 = vmatmul.mubr.f32.vlgmr.msra.gmra.mrb[0].mxu1 %v135_v33  ;;  %709 = vmatprep.subr.bf16.mxu0 %v708_v60  ;;  %v718_v33 = vpack.c.bf16 %v311_v25, %v307_v24  ;;  %v724_v47 = vpack.c.bf16 %v328_v42, %v324_v41  ;;  %v327_v49 = vld [vmem:[#allocation4 + $0x160] sm:$0xff]  ;;  %v756_v50 = vpack.c.bf16 %v330_v44, %v326_v43  ;;  %v325_v51 = vld [vmem:[#allocation4 + $0x150] sm:$0xff]  ;;  %v332_v55 = vld [vmem:[#allocation4 + $0x188] sm:$0xff] }
  0x4c   :  { %739 = vmatpush1.bf16.msra.mxu1 %v738_v59  ;;  %v329_v52 = vld [vmem:[#allocation4 + $0x170] sm:$0xff]  ;;  %v726_v53 = vpack.c.bf16 %v327_v49, %v323_v48  ;;  %v336_v56 = vld [vmem:[#allocation4 + $0x1a8] sm:$0xff]  ;;  %v334_v57 = vld [vmem:[#allocation4 + $0x198] sm:$0xff]  ;;  %504 = vmatprep.mubr.f32.mxu1 %v848_v17 }
  0x4d   :  { %741 = vmatprep.subr.bf16.mxu1 %v740_v1  ;;  %v758_v54 = vpack.c.bf16 %v329_v52, %v325_v51  ;;  %v728_v58 = vpack.c.bf16 %v336_v56, %v332_v55  ;;  %v338_v59 = vld [vmem:[#allocation4 + $0x1b8] sm:$0xff]  ;;  %v331_v60 = vld [vmem:[#allocation4 + $0x180] sm:$0xff]  ;;  %v333_v63 = vld [vmem:[#allocation4 + $0x190] sm:$0xff] }
  0x4e   :  { %711 = vmatpush1.bf16.msra.mxu0 %v710_v7  ;;  %v760_v61 = vpack.c.bf16 %v338_v59, %v334_v57  ;;  %v335_v62 = vld [vmem:[#allocation4 + $0x1a0] sm:$0xff]  ;;  %v337_v1 = vld [vmem:[#allocation4 + $0x1b0] sm:$0xff]  ;;  %v340_v4 = vld [vmem:[#allocation4 + $0x1c8] sm:$0xff] }
  0x4f   :  { %713 = vmatprep.subr.bf16.mxu0 %v712_v9  ;;  %v730_v2 = vpack.c.bf16 %v335_v62, %v331_v60  ;;  %v762_v3 = vpack.c.bf16 %v337_v1, %v333_v63  ;;  %v344_v5 = vld [vmem:[#allocation4 + $0x1e8] sm:$0xff]  ;;  %v342_v6 = vld [vmem:[#allocation4 + $0x1d8] sm:$0xff]  ;;  %v339_v9 = vld [vmem:[#allocation4 + $0x1c0] sm:$0xff] }
  0x50   :  { %743 = vmatpush1.bf16.msra.mxu1 %v742_v8  ;;  %v732_v7 = vpack.c.bf16 %v344_v5, %v340_v4  ;;  %v346_v8 = vld [vmem:[#allocation4 + $0x1f8] sm:$0xff]  ;;  %v343_v10 = vld [vmem:[#allocation4 + $0x1e0] sm:$0xff]  ;;  %v345_v15 = vld [vmem:[#allocation4 + $0x1f0] sm:$0xff] }
  0x51   :  { %745 = vmatprep.subr.bf16.mxu1 %v744_v14  ;;  %v764_v11 = vpack.c.bf16 %v346_v8, %v342_v6  ;;  %v734_v12 = vpack.c.bf16 %v343_v10, %v339_v9  ;;  %v341_v14 = vld [vmem:[#allocation4 + $0x1d0] sm:$0xff]  ;;  %v565_v19 = vld [vmem:[%s936_s2] ss:$0 sm:$0xff] }
  0x52   :  { %715 = vmatpush1.bf16.msra.mxu0 %v714_v20  ;;  %v766_v16 = vpack.c.bf16 %v345_v15, %v341_v14  ;;  %v347_v31 = vld [vmem:[%s938_s4] sm:$0xf] }
  0x53   :  { %717 = vmatprep.subr.bf16.mxu0 %v716_v23  ;;  %v356_v36 = vrot.slane %v347_v31, %v355_v32 }
  0x54   :  { %747 = vmatpush1.bf16.msra.mxu1 %v746_v21 }
  0x55   :  { %749 = vmatprep.subr.bf16.mxu1 %v748_v27 }
  0x56   :  { %719 = vmatpush1.bf16.msra.mxu0 %v718_v33  ;;  %v363_v33 = vsub.s32 3, %v903_v0 }
  0x57   :  { %721 = vmatprep.subr.bf16.mxu0 %v720_v35  ;;  %v360_v35 = vrot.slane %v347_v31, %v359_v30 }
  0x58   :  { %751 = vmatpush1.bf16.msra.mxu1 %v750_v34  ;;  %v352_v34 = vrot.slane %v347_v31, %v351_v29  ;;  %v364_v37 = vrot.slane %v347_v31, %v363_v33 }
  0x59   :  { %753 = vmatprep.subr.bf16.mxu1 %v752_v39 }
  0x5a   :  { %723 = vmatpush1.bf16.msra.mxu0 %v722_v45 }
  0x5b   :  { %725 = vmatprep.subr.bf16.mxu0 %v724_v47 }
  0x5c   :  { %755 = vmatpush1.bf16.msra.mxu1 %v754_v46 }
  0x5d   :  { %757 = vmatprep.subr.bf16.mxu1 %v756_v50 }
  0x5e   :  { %727 = vmatpush1.bf16.msra.mxu0 %v726_v53 }
  0x5f   :  { %729 = vmatprep.subr.bf16.mxu0 %v728_v58 }
  0x60   :  { %759 = vmatpush1.bf16.msra.mxu1 %v758_v54 }
  0x61   :  { %761 = vmatprep.subr.bf16.mxu1 %v760_v61 }
  0x62   :  { %731 = vmatpush1.bf16.msra.mxu0 %v730_v2 }
  0x63   :  { %733 = vmatprep.subr.bf16.mxu0 %v732_v7 }
  0x64   :  { %763 = vmatpush1.bf16.msra.mxu1 %v762_v3 }
  0x65   :  { %765 = vmatprep.subr.bf16.mxu1 %v764_v11 }
  0x66   :  { %735 = vmatpush1.bf16.msra.mxu0 %v734_v12 }
  0x68   :  { %767 = vmatpush1.bf16.msra.mxu1 %v766_v16 }
 0x11c   :  { %v602_v18 = vpop.f32.mrb[0].mxu0 }
 0x11d   :  { %v603_v20 = vpop.f32.mrb[1].mxu0 }
 0x11e   :  { %v637_v21 = vpop.f32.mrb[0].mxu1  ;;  %v604_v23 = vadd.f32 %v603_v20, %v602_v18 }
 0x11f   :  { %v638_v24 = vpop.f32.mrb[1].mxu1 }
 0x120   :  { %v639_v25 = vadd.f32 %v638_v24, %v637_v21  ;;  %v209_v26 = vadd.f32 %v604_v23, %v565_v19 }
 0x122   :  { %v279_v27 = vadd.f32 %v639_v25, %v209_v26 }
 0x124   :  { %v282_v28 = vmax.f32 %v279_v27, 0.0 }
 0x126   :  { %434 = vmatmul.mubr.f32.vlgmr.msra.gmra.mrb[2].mxu0 %v282_v28  ;;  %505 = vmatmul.mubr.f32.vlgmr.msra.gmra.mrb[2].mxu1 %v282_v28 }
 0x1f9   :  { %v435_v38 = vpop.f32.mrb[2].mxu0  ;;  %v506_v39 = vpop.f32.mrb[2].mxu1 }
 0x1fa   :  { %v436_v40 = vadd.f32 %v435_v38, %v352_v34  ;;  %v507_v41 = vadd.f32 %v506_v39, %v360_v35  ;;  %v437_v42 = vpop.f32.mrb[3].mxu0  ;;  %v508_v43 = vpop.f32.mrb[3].mxu1 }
 0x1fb   :  { %v438_v44 = vadd.f32 %v437_v42, %v356_v36  ;;  %v509_v45 = vadd.f32 %v508_v43, %v364_v37 }
 0x1fc   :  { %v566_v46 = vmul.f32 -1.442695, %v436_v40  ;;  %v568_v47 = vmul.f32 -1.442695, %v507_v41 }
 0x1fd   :  { %v567_v48 = vmul.f32 -1.442695, %v438_v44  ;;  %v569_v49 = vmul.f32 -1.442695, %v509_v45 }
 0x1fe   :  { %777 = vpow2.f32 %v566_v46 }
 0x1ff   :  { %779 = vpow2.f32 %v568_v47 }
 0x200   :  { %781 = vpow2.f32 %v567_v48 }
 0x201   :  { %783 = vpow2.f32 %v569_v49 }
 0x208   :  { %v778_v0 = vpop.eup %777 }
 0x209   :  { %v780_v50 = vpop.eup %779  ;;  %v523_v51 = vadd.f32 1.0, %v778_v0 }
 0x20a   :  { %v782_v52 = vpop.eup %781  ;;  %v525_v53 = vadd.f32 1.0, %v780_v50 }
 0x20b   :  { %v784_v54 = vpop.eup %783  ;;  %785 = vrcp.f32 %v523_v51  ;;  %v524_v55 = vadd.f32 1.0, %v782_v52 }
 0x20c   :  { %787 = vrcp.f32 %v525_v53  ;;  %v526_v56 = vadd.f32 1.0, %v784_v54 }
 0x20d   :  { %789 = vrcp.f32 %v524_v55 }
 0x20e   :  { %791 = vrcp.f32 %v526_v56 }
 0x215   :  { %v786_v57 = vpop.eup %785 }
 0x216   :  { %v788_v58 = vpop.eup %787 }
 0x217   :  { %v790_v59 = vpop.eup %789 }
 0x218   :  { %v792_v60 = vpop.eup %791  ;;  %v539_v61 = vcombine.low %v786_v57, %v790_v59 }
 0x219   :  { %v540_v62 = vcombine.low %v788_v58, %v792_v60 }
 0x21a   :  { %v547_v63 = vrot.slane %v539_v61, %v906_v13 }
 0x21b   :  { %v554_v1 = vrot.slane %v540_v62, %v906_v13 }
 0x21d   :  { %v555_v2 = vcombine.low %v547_v63, %v554_v1 }
 0x21f   :  { %v557_v3 = vmul.f32 %v555_v2, %v911_v22 }
 0x221   :  { %558 = vst [vmem:[%s939_s5] sm:$0xff] %v557_v3 }
 0x222   :  { %563 = vsyncpa [#allocation3], 1 }
 0x223   :  { %564 = vsyncpa [#allocation5], 1 }

</bundles_post_ra>
